<compile_context>
chip_gen: v6e
topology: v6e:2x2x1
jax: 0.10.0
libtpu: 0.0.40
codegen_flags: <defaults>
</compile_context>

<pallas_src>
import functools
import math

import jax
import jax.numpy as jnp
from jax.experimental import pallas as pl
from jax.experimental.pallas import tpu as pltpu


_SQRT_2_OVER_PI = math.sqrt(2.0 / math.pi)


def _gelu_tanh(x):
    # torch.nn.GELU(approximate='tanh'):
    # 0.5 * x * (1 + tanh(sqrt(2/pi) * (x + 0.044715 * x**3)))
    c = jnp.asarray(_SQRT_2_OVER_PI, x.dtype)
    return 0.5 * x * (1.0 + jnp.tanh(c * (x + 0.044715 * x * x * x)))


# --------------------------------------------------------------------------- #
# Kernels
# --------------------------------------------------------------------------- #
def _mlp_chunked_kernel(x_ref, w_fc_ref, b_fc_ref, w_proj_ref, b_proj_ref,
                        o_ref, acc_ref, *, gelu_dtype):
    # Grid: (row tiles [parallel], hidden chunks [arbitrary, reduction]).
    # x_ref:      (tm, C)   compute dtype
    # w_fc_ref:   (C, th)   weight chunk
    # b_fc_ref:   (1, th)   f32
    # w_proj_ref: (th, C)   weight chunk
    # b_proj_ref: (1, C)    f32
    # acc_ref:    (tm, C)   f32 accumulator, resident across k
    k = pl.program_id(1)

    @pl.when(k == 0)
    def _():
        acc_ref[...] = jnp.zeros_like(acc_ref)

    h = jnp.dot(x_ref[...], w_fc_ref[...], preferred_element_type=jnp.float32)
    h = _gelu_tanh((h + b_fc_ref[...]).astype(gelu_dtype))
    acc_ref[...] += jnp.dot(h.astype(w_proj_ref.dtype), w_proj_ref[...],
                            preferred_element_type=jnp.float32)

    @pl.when(k == pl.num_programs(1) - 1)
    def _():
        o_ref[...] = (acc_ref[...] + b_proj_ref[...]).astype(o_ref.dtype)


def _mlp_resident_kernel(x_ref, w_fc_ref, b_fc_ref, w_proj_ref, b_proj_ref,
                         o_ref, acc_ref, *, th, gelu_dtype):
    # Grid: (row tiles [parallel],).  Weights are fully VMEM-resident (constant
    # index_map -> DMA'd only once); the hidden dim is walked with static slices
    # so the full (tm, 4C) activation is never materialized.
    acc_ref[...] = jnp.zeros_like(acc_ref)
    x = x_ref[...]
    n_chunks = w_fc_ref.shape[1] // th
    for j in range(n_chunks):          # static trip count, unrolled at trace time
        lo = j * th
        h = jnp.dot(x, w_fc_ref[:, lo:lo + th],
                    preferred_element_type=jnp.float32)
        h = _gelu_tanh((h + b_fc_ref[:, lo:lo + th]).astype(gelu_dtype))
        acc_ref[...] += jnp.dot(h.astype(w_proj_ref.dtype),
                                w_proj_ref[lo:lo + th, :],
                                preferred_element_type=jnp.float32)
    o_ref[...] = (acc_ref[...] + b_proj_ref[...]).astype(o_ref.dtype)


# --------------------------------------------------------------------------- #
# Host-side helpers
# --------------------------------------------------------------------------- #
def _round_up(a, b):
    return (a + b - 1) // b * b


def _cdiv(a, b):
    return (a + b - 1) // b


def _pick_hidden_tile(H, requested, cap):
    """Largest divisor of H that is <= cap and (multiple of 128 or == H)."""
    cap = min(cap, H)
    if cap <= 0:
        cap = H
    if requested is not None and 0 < requested <= cap and H % requested == 0:
        return requested
    for t in range(cap, 0, -1):
        if H % t == 0 and (t % 128 == 0 or t == H):
            return t
    return H


@functools.lru_cache(maxsize=1)
def _tpu_info():
    kind = ""
    try:
        kind = jax.devices()[0].device_kind.lower()
    except Exception:
        pass
    vmem_cap = None
    try:
        vmem_cap = int(pltpu.get_tpu_info().vmem_capacity_bytes)
    except Exception:
        vmem_cap = None
    is_v5 = "v5" in kind
    is_v7 = ("v7" in kind) or ("tpu7" in kind) or ("7x" in kind)
    if vmem_cap is None or vmem_cap <= 0:
        if is_v7 or not kind:
            vmem_cap = 64 * 1024 * 1024        # conservative default (v7x-sized)
        else:
            vmem_cap = 128 * 1024 * 1024       # v4/v5/v6
    return kind, vmem_cap, is_v5, is_v7


def mlp_forward(x, w_fc, b_fc, w_proj, b_proj, *, tm=None, th=None,
                compute_dtype=None, resident=None, gelu_low_precision=None):
    """GPT-2 MLP forward.

    x:      (B, T, C)
    w_fc:   (C, 4C)    (transposed w.r.t. torch nn.Linear weight)
    b_fc:   (4C,) or (1, 4C)
    w_proj: (4C, C)
    b_proj: (C,) or (1, C)

    Pass weights already cast to the desired MXU dtype (e.g. bf16) so no per-call
    full-weight HBM cast pass is needed; compute_dtype defaults to w_fc.dtype.
    Returns (B, T, C) in x.dtype.
    """
    B, T, C = x.shape
    H = w_fc.shape[1]                      # 4 * C
    M = B * T

    if compute_dtype is None:
        compute_dtype = w_fc.dtype
    compute_dtype = jnp.dtype(compute_dtype)
    wb = compute_dtype.itemsize
    out_dtype = x.dtype
    ob = jnp.dtype(out_dtype).itemsize

    kind, vmem_cap, is_v5, is_v7 = _tpu_info()
    limit_cap = max(32 * 1024 * 1024, int(vmem_cap * 0.82))

    # ---- row tile: large enough to clear the HBM ridge; smaller on v5e.
    if tm is None:
        tm = 512 if is_v5 else 1024
    tm = max(16, min(tm, _round_up(M, 16)))
    tm = _round_up(tm, 16)
    # v7x megacore: keep >= 2 row tiles when there is enough work for both cores.
    if is_v7 and M > 256 and _round_up(M, 16) <= tm:
        tm = max(256, _round_up(_cdiv(M, 2), 128))

    # ---- hidden tile: largest clean divisor of H within a bounded VMEM slice.
    chunk_budget = min(20 * 1024 * 1024, limit_cap // 3)
    th_cap = max(128, chunk_budget // max(1, 4 * C * wb))
    th = _pick_hidden_tile(H, th, th_cap)

    def chunked_bytes(tm_, th_):
        return (2 * 2 * C * th_ * wb        # w_fc + w_proj chunks, double-buffered
                + 2 * (th_ + C) * 4         # bias chunks (f32)
                + 2 * tm_ * C * wb          # x tiles
                + 2 * tm_ * C * ob          # out tiles
                + tm_ * C * 4               # f32 accumulator scratch
                + tm_ * th_ * (4 + wb))     # hidden intermediate + low-prec copy

    def resident_bytes(tm_, th_):
        return (2 * 2 * C * H * wb          # both weights resident (2x safety)
                + 2 * (H + C) * 4           # biases (f32)
                + 2 * tm_ * C * wb          # x tiles
                + 2 * tm_ * C * ob          # out tiles
                + tm_ * C * 4               # f32 accumulator scratch
                + tm_ * th_ * (4 + wb))     # hidden intermediate + low-prec copy

    use_resident = resident
    if use_resident is None:
        use_resident = resident_bytes(tm, th) <= int(0.9 * limit_cap)
    if use_resident and resident_bytes(tm, th) > limit_cap:
        use_resident = False

    if not use_resident:
        # shrink tiles until the chunked pipeline fits under the scoped limit
        while chunked_bytes(tm, th) > limit_cap:
            new_th = _pick_hidden_tile(H, None, max(128, th // 2)) if th > 128 else th
            if new_th < th:
                th = new_th
            elif tm > 16:
                tm = max(16, _round_up(tm // 2, 16))
            else:
                break

    M_pad = _round_up(M, tm)

    # ---- operands (casts are no-ops when params are pre-cast).
    x2 = x.reshape(M, C)
    if x2.dtype != compute_dtype:
        x2 = x2.astype(compute_dtype)
    if M_pad != M:
        x2 = jnp.pad(x2, ((0, M_pad - M), (0, 0)))
    w_fc_c = w_fc if w_fc.dtype == compute_dtype else w_fc.astype(compute_dtype)
    w_proj_c = w_proj if w_proj.dtype == compute_dtype else w_proj.astype(compute_dtype)
    b_fc32 = b_fc.reshape(1, H).astype(jnp.float32)
    b_proj32 = b_proj.reshape(1, C).astype(jnp.float32)

    # GELU precision: bf16 on v6e/v7x (bf16 VPU/EUP), f32 on v5e / unknown gen.
    if gelu_low_precision is None:
        gelu_low_precision = (compute_dtype == jnp.dtype(jnp.bfloat16)
                              and bool(kind) and not is_v5)
    gelu_dtype = compute_dtype if gelu_low_precision else jnp.float32

    if use_resident:
        needed = resident_bytes(tm, th)
        vmem_limit = int(min(max(int(needed * 1.25), 32 * 1024 * 1024), limit_cap))
        out2 = pl.pallas_call(
            functools.partial(_mlp_resident_kernel, th=th, gelu_dtype=gelu_dtype),
            out_shape=jax.ShapeDtypeStruct((M_pad, C), out_dtype),
            grid_spec=pltpu.PrefetchScalarGridSpec(
                num_scalar_prefetch=0,
                grid=(M_pad // tm,),
                in_specs=[
                    pl.BlockSpec((tm, C), lambda i: (i, 0)),   # x rows tile
                    pl.BlockSpec((C, H), lambda i: (0, 0)),    # w_fc (resident)
                    pl.BlockSpec((1, H), lambda i: (0, 0)),    # b_fc (resident)
                    pl.BlockSpec((H, C), lambda i: (0, 0)),    # w_proj (resident)
                    pl.BlockSpec((1, C), lambda i: (0, 0)),    # b_proj (resident)
                ],
                out_specs=pl.BlockSpec((tm, C), lambda i: (i, 0)),
                scratch_shapes=[pltpu.VMEM((tm, C), jnp.float32)],
            ),
            compiler_params=pltpu.CompilerParams(
                dimension_semantics=("parallel",),
                vmem_limit_bytes=vmem_limit),
        )(x2, w_fc_c, b_fc32, w_proj_c, b_proj32)
    else:
        needed = chunked_bytes(tm, th)
        vmem_limit = int(min(max(int(needed * 1.25), 32 * 1024 * 1024), limit_cap))
        out2 = pl.pallas_call(
            functools.partial(_mlp_chunked_kernel, gelu_dtype=gelu_dtype),
            out_shape=jax.ShapeDtypeStruct((M_pad, C), out_dtype),
            grid_spec=pltpu.PrefetchScalarGridSpec(
                num_scalar_prefetch=0,
                grid=(M_pad // tm, H // th),      # rows parallel, reduction last
                in_specs=[
                    pl.BlockSpec((tm, C), lambda i, k: (i, 0)),   # x rows tile
                    pl.BlockSpec((C, th), lambda i, k: (0, k)),   # w_fc chunk
                    pl.BlockSpec((1, th), lambda i, k: (0, k)),   # b_fc chunk
                    pl.BlockSpec((th, C), lambda i, k: (k, 0)),   # w_proj chunk
                    pl.BlockSpec((1, C), lambda i, k: (0, 0)),    # b_proj (constant)
                ],
                out_specs=pl.BlockSpec((tm, C), lambda i, k: (i, 0)),
                scratch_shapes=[pltpu.VMEM((tm, C), jnp.float32)],
            ),
            compiler_params=pltpu.CompilerParams(
                dimension_semantics=("parallel", "arbitrary"),
                vmem_limit_bytes=vmem_limit),
        )(x2, w_fc_c, b_fc32, w_proj_c, b_proj32)

    return out2[:M].reshape(B, T, C)


def init_params(key, n_embd, dtype=jnp.float32):
    """Deterministic init mirroring nn.Linear shapes (stored transposed)."""
    k1, k2, k3, k4 = jax.random.split(key, 4)
    h = 4 * n_embd
    lim_fc = 1.0 / math.sqrt(n_embd)
    lim_pr = 1.0 / math.sqrt(h)
    w_fc = jax.random.uniform(k1, (n_embd, h), dtype, -lim_fc, lim_fc)
    b_fc = jax.random.uniform(k2, (1, h), dtype, -lim_fc, lim_fc)
    w_proj = jax.random.uniform(k3, (h, n_embd), dtype, -lim_pr, lim_pr)
    b_proj = jax.random.uniform(k4, (1, n_embd), dtype, -lim_pr, lim_pr)
    return w_fc, b_fc, w_proj, b_proj


if __name__ == "__main__":
    B, T, n_embd = 2, 8, 32

    key = jax.random.PRNGKey(0)
    kx, kp = jax.random.split(key)
    x = jax.random.normal(kx, (B, T, n_embd), jnp.float32)
    w_fc, b_fc, w_proj, b_proj = init_params(kp, n_embd)

    # Plain-JAX f32 reference (same math as the torch module).
    h_ref = _gelu_tanh(x.reshape(-1, n_embd) @ w_fc + b_fc)
    y_ref = (h_ref @ w_proj + b_proj).reshape(B, T, n_embd)

    # 1) f32 compute, auto variant (resident weights): tight tolerance.
    out_res = mlp_forward(x, w_fc, b_fc, w_proj, b_proj,
                          compute_dtype=jnp.float32)
    out_res = jax.block_until_ready(out_res)
    assert jnp.allclose(out_res, y_ref, atol=1e-5, rtol=1e-5)

    # 2) f32 compute, forced chunk-streaming variant (covers the second kernel).
    out_chk = mlp_forward(x, w_fc, b_fc, w_proj, b_proj,
                          compute_dtype=jnp.float32, resident=False)
    out_chk = jax.block_until_ready(out_chk)
    assert jnp.allclose(out_chk, y_ref, atol=1e-5, rtol=1e-5)

    # 3) Production-style bf16 path: weights pre-cast ONCE outside the forward
    #    (no per-call weight cast); loosened tolerance.
    w_fc_bf16 = w_fc.astype(jnp.bfloat16)
    w_proj_bf16 = w_proj.astype(jnp.bfloat16)
    out_bf16 = mlp_forward(x, w_fc_bf16, b_fc, w_proj_bf16, b_proj)
    out_bf16 = jax.block_until_ready(out_bf16)
    assert jnp.allclose(out_bf16, y_ref, atol=3e-2, rtol=3e-2)

    print("KERNEL_OK")
</pallas_src>

<mosaic_0001>
module attributes {stable_mosaic.version = 11 : i64} {
  func.func @_mlp_resident_kernel(%arg0: i32, %arg1: memref<16x32xf32, #tpu.memory_space<vmem>>, %arg2: memref<32x128xf32, #tpu.memory_space<vmem>>, %arg3: memref<1x128xf32, #tpu.memory_space<vmem>>, %arg4: memref<128x32xf32, #tpu.memory_space<vmem>>, %arg5: memref<1x32xf32, #tpu.memory_space<vmem>>, %arg6: memref<16x32xf32, #tpu.memory_space<vmem>>, %arg7: memref<16x32xf32, #tpu.memory_space<vmem>>) attributes {dimension_semantics = [#tpu.dimension_semantics<parallel>], iteration_bounds = array<i64: 1>, scalar_prefetch = 0 : i64, scratch_operands = 1 : i64, tpu.core_type = #tpu.core_type<tc>, window_params = [{transform_indices = @transform_0, window_bounds = array<i64: 16, 32>}, {pipeline_mode = #tpu.pipeline_mode<synchronous>, transform_indices = @transform_1, window_bounds = array<i64: 32, 128>}, {pipeline_mode = #tpu.pipeline_mode<synchronous>, transform_indices = @transform_2, window_bounds = array<i64: 1, 128>}, {pipeline_mode = #tpu.pipeline_mode<synchronous>, transform_indices = @transform_3, window_bounds = array<i64: 128, 32>}, {pipeline_mode = #tpu.pipeline_mode<synchronous>, transform_indices = @transform_4, window_bounds = array<i64: 1, 32>}, {transform_indices = @transform_5, window_bounds = array<i64: 16, 32>}]} {
    %cst = arith.constant 0.000000e+00 : f32
    %0 = vector.broadcast %cst : f32 to vector<16x32xf32>
    %c0 = arith.constant 0 : index
    %c0_0 = arith.constant 0 : index
    %1 = vector.load %arg7[%c0, %c0_0] : memref<16x32xf32, #tpu.memory_space<vmem>>, vector<16x32xf32>
    tpu.vector_store %arg7[%c0, %c0_0], %0 {strides = array<i32>} : memref<16x32xf32, #tpu.memory_space<vmem>>, vector<16x32xf32>,
    %c0_1 = arith.constant 0 : index
    %c0_2 = arith.constant 0 : index
    %2 = vector.load %arg1[%c0_1, %c0_2] : memref<16x32xf32, #tpu.memory_space<vmem>>, vector<16x32xf32>
    %c0_3 = arith.constant 0 : index
    %c0_4 = arith.constant 0 : index
    %3 = vector.load %arg2[%c0_3, %c0_4] : memref<32x128xf32, #tpu.memory_space<vmem>>, vector<32x128xf32>
    %cst_5 = arith.constant dense<0.000000e+00> : vector<16x128xf32>
    %4 = tpu.matmul %2, %3, %cst_5 {dimension_numbers = #tpu.dot_dimension_numbers<[1], [0], [0], [1], [0, 0, 1, 1], [], []>} : vector<16x32xf32>, vector<32x128xf32>, vector<16x128xf32> -> vector<16x128xf32>
    %c0_6 = arith.constant 0 : index
    %c0_7 = arith.constant 0 : index
    %5 = vector.load %arg3[%c0_6, %c0_7] : memref<1x128xf32, #tpu.memory_space<vmem>>, vector<1x128xf32>
    %6 = vector.broadcast %5 : vector<1x128xf32> to vector<16x128xf32>
    %7 = arith.addf %4, %6 : vector<16x128xf32>
    %cst_8 = arith.constant 5.000000e-01 : f32
    %8 = vector.broadcast %cst_8 : f32 to vector<16x128xf32>
    %9 = arith.mulf %8, %7 : vector<16x128xf32>
    %cst_9 = arith.constant 4.471500e-02 : f32
    %10 = vector.broadcast %cst_9 : f32 to vector<16x128xf32>
    %11 = arith.mulf %10, %7 : vector<16x128xf32>
    %12 = arith.mulf %11, %7 : vector<16x128xf32>
    %13 = arith.mulf %12, %7 : vector<16x128xf32>
    %14 = arith.addf %7, %13 : vector<16x128xf32>
    %cst_10 = arith.constant 0.797884583 : f32
    %15 = vector.broadcast %cst_10 : f32 to vector<16x128xf32>
    %16 = arith.mulf %15, %14 : vector<16x128xf32>
    %17 = math.tanh %16 : vector<16x128xf32>
    %cst_11 = arith.constant 1.000000e+00 : f32
    %18 = vector.broadcast %cst_11 : f32 to vector<16x128xf32>
    %19 = arith.addf %18, %17 : vector<16x128xf32>
    %20 = arith.mulf %9, %19 : vector<16x128xf32>
    %c0_12 = arith.constant 0 : index
    %c0_13 = arith.constant 0 : index
    %21 = vector.load %arg7[%c0_12, %c0_13] : memref<16x32xf32, #tpu.memory_space<vmem>>, vector<16x32xf32>
    %c0_14 = arith.constant 0 : index
    %c0_15 = arith.constant 0 : index
    %22 = vector.load %arg4[%c0_14, %c0_15] : memref<128x32xf32, #tpu.memory_space<vmem>>, vector<128x32xf32>
    %cst_16 = arith.constant dense<0.000000e+00> : vector<16x32xf32>
    %23 = tpu.matmul %20, %22, %cst_16 {dimension_numbers = #tpu.dot_dimension_numbers<[1], [0], [0], [1], [0, 0, 1, 1], [], []>} : vector<16x128xf32>, vector<128x32xf32>, vector<16x32xf32> -> vector<16x32xf32>
    %24 = arith.addf %21, %23 : vector<16x32xf32>
    %c0_17 = arith.constant 0 : index
    %c0_18 = arith.constant 0 : index
    %25 = vector.load %arg7[%c0_17, %c0_18] : memref<16x32xf32, #tpu.memory_space<vmem>>, vector<16x32xf32>
    tpu.vector_store %arg7[%c0_17, %c0_18], %24 {strides = array<i32>} : memref<16x32xf32, #tpu.memory_space<vmem>>, vector<16x32xf32>,
    %c0_19 = arith.constant 0 : index
    %c0_20 = arith.constant 0 : index
    %26 = vector.load %arg7[%c0_19, %c0_20] : memref<16x32xf32, #tpu.memory_space<vmem>>, vector<16x32xf32>
    %c0_21 = arith.constant 0 : index
    %c0_22 = arith.constant 0 : index
    %27 = vector.load %arg5[%c0_21, %c0_22] : memref<1x32xf32, #tpu.memory_space<vmem>>, vector<1x32xf32>
    %28 = vector.broadcast %27 : vector<1x32xf32> to vector<16x32xf32>
    %29 = arith.addf %26, %28 : vector<16x32xf32>
    %c0_23 = arith.constant 0 : index
    %c0_24 = arith.constant 0 : index
    %30 = vector.load %arg6[%c0_23, %c0_24] : memref<16x32xf32, #tpu.memory_space<vmem>>, vector<16x32xf32>
    tpu.vector_store %arg6[%c0_23, %c0_24], %29 {strides = array<i32>} : memref<16x32xf32, #tpu.memory_space<vmem>>, vector<16x32xf32>,
    return
  }
  func.func @transform_0(%arg0: i32) -> (i32, i32) {
    %c0_i32 = arith.constant 0 : i32
    %c0_i32_0 = arith.constant 0 : i32
    return %arg0, %c0_i32 : i32, i32
  }
  func.func @transform_1(%arg0: i32) -> (i32, i32) {
    %c0_i32 = arith.constant 0 : i32
    %c0_i32_0 = arith.constant 0 : i32
    %c0_i32_1 = arith.constant 0 : i32
    return %c0_i32, %c0_i32_0 : i32, i32
  }
  func.func @transform_2(%arg0: i32) -> (i32, i32) {
    %c0_i32 = arith.constant 0 : i32
    %c0_i32_0 = arith.constant 0 : i32
    %c0_i32_1 = arith.constant 0 : i32
    return %c0_i32, %c0_i32_0 : i32, i32
  }
  func.func @transform_3(%arg0: i32) -> (i32, i32) {
    %c0_i32 = arith.constant 0 : i32
    %c0_i32_0 = arith.constant 0 : i32
    %c0_i32_1 = arith.constant 0 : i32
    return %c0_i32, %c0_i32_0 : i32, i32
  }
  func.func @transform_4(%arg0: i32) -> (i32, i32) {
    %c0_i32 = arith.constant 0 : i32
    %c0_i32_0 = arith.constant 0 : i32
    %c0_i32_1 = arith.constant 0 : i32
    return %c0_i32, %c0_i32_0 : i32, i32
  }
  func.func @transform_5(%arg0: i32) -> (i32, i32) {
    %c0_i32 = arith.constant 0 : i32
    %c0_i32_0 = arith.constant 0 : i32
    return %arg0, %c0_i32 : i32, i32
  }
}

</mosaic_0001>

<bundles_post_ra>
// kernel: tpu_custom_call.1
= control target key start
LH: loop header
LB: loop body
LE: loop exit
PB: predicated region body
PF: predicated region fallthrough
CT: control target
= control target key end

     0   :  { %vm21_vm0 = vcmask 261120   ;;  %s483_s0 = inlined_call_operand.vmem [shape: f32[16,32], index: 0, kind: input, shape index: {}]   ;;  %s484_s1 = inlined_call_operand.vmem [shape: f32[32,128], index: 1, kind: input, shape index: {}]   ;;  %s485_s2 = inlined_call_operand.vmem [shape: f32[1,128], index: 2, kind: input, shape index: {}]   ;;  %s486_s3 = inlined_call_operand.vmem [shape: f32[128,32], index: 3, kind: input, shape index: {}]   ;;  %s487_s4 = inlined_call_operand.vmem [shape: f32[1,32], index: 4, kind: input, shape index: {}]   ;;  %s488_s5 = inlined_call_operand.hbm [shape: f32[16,32], index: 5, kind: output, shape index: {}]  }
   0x1   :  { %v29_v0 = vld [vmem:[%s484_s1 + $0x18] sm:$0xff]  ;;  %v28_v1 = vld [vmem:[%s484_s1 + $0x10] sm:$0xff]  ;;  %v24_v2 = vld [vmem:[%s483_s0] sm:$0xff] }
   0x2   :  { %290 = vmatprep.subr.mxu0 %v29_v0  ;;  %v27_v3 = vld [vmem:[%s484_s1 + $0x8] sm:$0xff]  ;;  %298 = vmatprep.mubr.msk.f32.mxu0 %vm21_vm0, %v24_v2 }
   0x3   :  { %291 = vmatpush3.msra.mxu0 %v29_v0 }
   0x4   :  { %10 = vsyncpa [#allocation4], 0  ;;  %292 = vmatprep.subr.mxu0 %v28_v1  ;;  %v26_v4 = vld [vmem:[%s484_s1] sm:$0xff]  ;;  %v25_v5 = vld [vmem:[%s483_s0 + $0x8] sm:$0xff]  ;;  %v366_v22 = vmov 0.0   ;;  %s367_s10 = smov [#allocation3]  }
   0x5   :  { %293 = vmatpush3.msra.mxu0 %v28_v1  ;;  %v153_v6 = vld [vmem:[%s486_s3 + $0x78] sm:$0xff]  ;;  %v152_v7 = vld [vmem:[%s486_s3 + $0x70] sm:$0xff]  ;;  %v151_v8 = vld [vmem:[%s486_s3 + $0x68] sm:$0xff]  ;;  %23 = vst.msk [vmem:[#allocation2 + $0x8] sm:$0xff] %vm21_vm0, %v366_v22  ;;  %s251_s11 = sshll.u32 %s367_s10, 4  ;;  %s252_s11 = int_to_ptr.vmem [resolvable:$true] %s251_s11 }
   0x6   :  { %294 = vmatprep.subr.mxu0 %v27_v3  ;;  %301 = vmatprep.subr.mxu1 %v153_v6  ;;  %v150_v9 = vld [vmem:[%s486_s3 + $0x60] sm:$0xff]  ;;  %v149_v10 = vld [vmem:[%s486_s3 + $0x58] sm:$0xff]  ;;  %v148_v11 = vld [vmem:[%s486_s3 + $0x50] sm:$0xff]  ;;  %22 = vst.msk [vmem:[#allocation2] sm:$0xff] %vm21_vm0, %v366_v22  ;;  %s344_s12 = scalar_lea.vmem %s252_s11, 256  ;;  %p349_p1 = scmp.lt.s32.totalorder %s252_s11, %s252_s11 }
   0x7   :  { %295 = vmatpush3.msra.mxu0 %v27_v3  ;;  %302 = vmatpush3.msra.mxu1 %v153_v6  ;;  %v147_v12 = vld [vmem:[%s486_s3 + $0x48] sm:$0xff]  ;;  %v146_v13 = vld [vmem:[%s486_s3 + $0x40] sm:$0xff]  ;;  %v145_v14 = vld [vmem:[%s486_s3 + $0x38] sm:$0xff]  ;;  %p345_p0 = scmp.ne.s32.totalorder %s252_s11, %s344_s12  ;;  %p350_p2 = scmp.lt.s32.totalorder %s344_s12, %s344_s12 }
   0x8   :  { %296 = vmatprep.subr.mxu0 %v26_v4  ;;  %303 = vmatprep.subr.mxu1 %v152_v7  ;;  %v144_v15 = vld [vmem:[%s486_s3 + $0x30] sm:$0xff]  ;;  %v143_v16 = vld [vmem:[%s486_s3 + $0x28] sm:$0xff]  ;;  %v142_v17 = vld [vmem:[%s486_s3 + $0x20] sm:$0xff] }
   0x9   :  { %297 = vmatpush3.msra.mxu0 %v26_v4  ;;  %304 = vmatpush3.msra.mxu1 %v152_v7  ;;  %v141_v18 = vld [vmem:[%s486_s3 + $0x18] sm:$0xff]  ;;  %v140_v19 = vld [vmem:[%s486_s3 + $0x10] sm:$0xff]  ;;  %v139_v20 = vld [vmem:[%s486_s3 + $0x8] sm:$0xff]  ;;  %p351_p3 = por %p350_p2, %p349_p1 }
   0xa   :  { %299 = vmatmul.mubr.msk.f32.vlgmr.msra.gmra.mxu0 %vm21_vm0, %v25_v5  ;;  %305 = vmatprep.subr.mxu1 %v151_v8  ;;  %v138_v21 = vld [vmem:[%s486_s3] sm:$0xff] }
   0xb   :  { %306 = vmatpush3.msra.mxu1 %v151_v8  ;;  %v262_v23 = vld [vmem:[%s485_s2] ss:$0 sm:$0xff]  ;;  %p352_p4 = pnand %p351_p3, %p345_p0 }
   0xc   :  { %307 = vmatprep.subr.mxu1 %v150_v9  ;;  %v137_v46 = vld [vmem:[#allocation2 + $0x8] sm:$0xff]  ;;  %v265_v52 = vld [vmem:[%s487_s4] ss:$0 sm:$0xff] }
   0xd   :  { %308 = vmatpush3.msra.mxu1 %v150_v9  ;;  %v136_v48 = vld [vmem:[#allocation2] sm:$0xff] }
   0xe   :  { %309 = vmatprep.subr.mxu1 %v149_v10 }
   0xf   :  { %310 = vmatpush3.msra.mxu1 %v149_v10 }
  0x10   :  { %311 = vmatprep.subr.mxu1 %v148_v11 }
  0x11   :  { %312 = vmatpush3.msra.mxu1 %v148_v11 }
  0x12   :  { %313 = vmatprep.subr.mxu1 %v147_v12 }
  0x13   :  { %314 = vmatpush3.msra.mxu1 %v147_v12 }
  0x14   :  { %315 = vmatprep.subr.mxu1 %v146_v13 }
  0x15   :  { %316 = vmatpush3.msra.mxu1 %v146_v13 }
  0x16   :  { %317 = vmatprep.subr.mxu1 %v145_v14 }
  0x17   :  { %318 = vmatpush3.msra.mxu1 %v145_v14 }
  0x18   :  { %319 = vmatprep.subr.mxu1 %v144_v15 }
  0x19   :  { %320 = vmatpush3.msra.mxu1 %v144_v15 }
  0x1a   :  { %321 = vmatprep.subr.mxu1 %v143_v16 }
  0x1b   :  { %322 = vmatpush3.msra.mxu1 %v143_v16 }
  0x1c   :  { %323 = vmatprep.subr.mxu1 %v142_v17 }
  0x1d   :  { %324 = vmatpush3.msra.mxu1 %v142_v17 }
  0x1e   :  { %325 = vmatprep.subr.mxu1 %v141_v18 }
  0x1f   :  { %326 = vmatpush3.msra.mxu1 %v141_v18 }
  0x20   :  { %327 = vmatprep.subr.mxu1 %v140_v19 }
  0x21   :  { %328 = vmatpush3.msra.mxu1 %v140_v19 }
  0x22   :  { %329 = vmatprep.subr.mxu1 %v139_v20 }
  0x23   :  { %330 = vmatpush3.msra.mxu1 %v139_v20 }
  0x24   :  { %331 = vmatprep.subr.mxu1 %v138_v21 }
  0x25   :  { %332 = vmatpush3.msra.mxu1 %v138_v21 }
  0xca   :  { %v300_v24 = vpop.f32.mrf.mxu0 }
  0xcb   :  { %v115_v25 = vadd.f32 %v300_v24, %v262_v23 }
  0xcc   :  { %v109_v26 = vpop.f32.mrf.mxu0 }
  0xcd   :  { %v121_v27 = vmul.f32 0.044715, %v115_v25  ;;  %v110_v28 = vadd.f32 %v262_v23, %v109_v26  ;;  %v119_v43 = vmul.f32 0.5, %v115_v25 }
  0xcf   :  { %v123_v29 = vmul.f32 %v121_v27, %v115_v25  ;;  %v120_v30 = vmul.f32 0.044715, %v110_v28  ;;  %v118_v41 = vmul.f32 0.5, %v110_v28 }
  0xd1   :  { %v122_v31 = vmul.f32 %v120_v30, %v110_v28  ;;  %v125_v32 = vmul.f32 %v123_v29, %v115_v25 }
  0xd3   :  { %v124_v33 = vmul.f32 %v122_v31, %v110_v28  ;;  %v127_v34 = vadd.f32 %v125_v32, %v115_v25 }
  0xd5   :  { %v126_v35 = vadd.f32 %v124_v33, %v110_v28  ;;  %v129_v36 = vmul.f32 0.7978846, %v127_v34 }
  0xd7   :  { %v128_v37 = vmul.f32 0.7978846, %v126_v35  ;;  %340 = vtanh.f32 %v129_v36 }
  0xd9   :  { %342 = vtanh.f32 %v128_v37 }
  0xe4   :  { %v341_v38 = vpop.eup %340 }
  0xe5   :  { %v133_v40 = vadd.f32 1.0, %v341_v38 }
  0xe6   :  { %v343_v39 = vpop.eup %342 }
  0xe7   :  { %v132_v42 = vadd.f32 1.0, %v343_v39  ;;  %v135_v45 = vmul.f32 %v133_v40, %v119_v43 }
  0xe9   :  { %v134_v44 = vmul.f32 %v132_v42, %v118_v41 }
  0xeb   :  { %333 = vmatprep.mubr.f32.mxu1 %v134_v44 }
  0xec   :  { %334 = vmatmul.mubr.f32.vlgmr.msra.gmra.mxu1 %v135_v45 }
 0x1ac   :  { %v335_v47 = vpop.f32.mrf.mxu1 }
 0x1ad   :  { %v230_v49 = vadd.f32 %v335_v47, %v137_v46 }
 0x1ae   :  { %v220_v50 = vpop.f32.mrf.mxu1 }
 0x1af   :  { %232 = vst.msk [vmem:[#allocation2 + $0x8] sm:$0xff] %vm21_vm0, %v230_v49  ;;  %v229_v51 = vadd.f32 %v220_v50, %v136_v48 }
 0x1b1   :  { %231 = vst.msk [vmem:[#allocation2] sm:$0xff] %vm21_vm0, %v229_v51 }
 0x1b6   :  { %v234_v53 = vld [vmem:[#allocation2 + $0x8] sm:$0xff] }
 0x1b7   :  { %v243_v54 = vadd.f32 %v265_v52, %v234_v53 }
 0x1b8   :  { %v233_v55 = vld [vmem:[#allocation2] sm:$0xff] }
 0x1b9   :  { %v242_v56 = vadd.f32 %v265_v52, %v233_v55  ;;  %245 = vst.msk [vmem:[#allocation3 + $0x8] sm:$0xff] %vm21_vm0, %v243_v54 }
 0x1bb   :  { %244 = vst.msk [vmem:[#allocation3] sm:$0xff] %vm21_vm0, %v242_v56 }
 0x1bc   :  { %355 = shalt.err (!%p352_p4)
}
 0x1bd   :  { %s368_s13 = smov 128   ;;  %s369_s4 = smov 8  }
 0x1be   :  { %257 = dma.vmem_to_hbm [thread:$0]  %s252_s11, 256, %s488_s5, [#allocation4], %s368_s13, %s368_s13, %s369_s4  }
 0x1bf   :  { %364 = dma.done.wait [#allocation4], 256  }
 0x1c0   :  { %365 = vsyncadd [#allocation4], 4294967040 }
 0x1c1   :  { %261 = vsyncpa [#allocation4], 1 }

</bundles_post_ra>
